<compile_context>
chip_gen: v7x
topology: tpu7x:2x2x1
jax: 0.10.0
libtpu: 0.0.40
codegen_flags: <defaults>
</compile_context>

<pallas_src>
import functools

import jax
import jax.numpy as jnp
from jax.experimental import pallas as pl
from jax.experimental.pallas import tpu as pltpu

LANE = 128


def _round_up(x, m):
    return ((x + m - 1) // m) * m


def actor_mlp_kernel(x_ref, w1_ref, b1_ref, w2_ref, b2_ref, w3_ref, b3_ref, mean_ref):
    # fc1 + ReLU  (MXU matmul in bf16, f32 accumulation, f32 elementwise)
    x = x_ref[...].astype(jnp.bfloat16)
    h1 = jnp.dot(x, w1_ref[...], preferred_element_type=jnp.float32)
    h1 = jnp.maximum(h1 + b1_ref[...], 0.0)
    # fc2 + ReLU
    h2 = jnp.dot(h1.astype(jnp.bfloat16), w2_ref[...], preferred_element_type=jnp.float32)
    h2 = jnp.maximum(h2 + b2_ref[...], 0.0)
    # fc3 (mean head, output lane-padded to a multiple of 128 -> unmasked vst)
    mean = jnp.dot(h2.astype(jnp.bfloat16), w3_ref[...], preferred_element_type=jnp.float32)
    mean_ref[...] = (mean + b3_ref[...]).astype(mean_ref.dtype)


@functools.partial(jax.jit, static_argnames=("tile_b",))
def actor_forward(x, params, tile_b=128):
    """x: (B, state_size) float32.  Returns (mean (B, A) f32, std (A,) f32)."""
    w1, b1, w2, b2, w3, b3, log_std = params
    B, S = x.shape
    H1 = w1.shape[1]
    H2 = w2.shape[1]
    A = w3.shape[1]

    # --- lane-dense mean head: pad action dim to a multiple of 128 lanes ---
    A_pad = _round_up(A, LANE)
    w3p = jnp.zeros((H2, A_pad), w3.dtype).at[:, :A].set(w3)
    b3p = jnp.zeros((1, A_pad), b3.dtype).at[:, :A].set(b3)

    # --- batch grid: tile rows, keep weights resident in VMEM across steps ---
    tb = min(tile_b, _round_up(B, 8))          # sublane-aligned batch tile
    B_pad = _round_up(B, tb)
    if B_pad != B:
        x = jnp.pad(x, ((0, B_pad - B), (0, 0)))
    grid = (B_pad // tb,)

    # bf16 matmul operands (biases stay f32)
    w1b = w1.astype(jnp.bfloat16)
    w2b = w2.astype(jnp.bfloat16)
    w3b = w3p.astype(jnp.bfloat16)

    resident = lambda shape: pl.BlockSpec(shape, lambda i: (0,) * len(shape))

    flops = 2 * B_pad * (S * H1 + H1 * H2 + H2 * A_pad)
    bytes_accessed = (x.size * 4
                      + (w1b.size + w2b.size + w3b.size) * 2
                      + (b1.size + b2.size + b3p.size) * 4
                      + B_pad * A_pad * 4)

    mean_pad = pl.pallas_call(
        actor_mlp_kernel,
        out_shape=jax.ShapeDtypeStruct((B_pad, A_pad), jnp.float32),
        grid=grid,
        in_specs=[
            pl.BlockSpec((tb, S), lambda i: (i, 0)),       # x: streamed per grid step
            resident(w1b.shape), resident(b1.shape),       # weights/biases: resident
            resident(w2b.shape), resident(b2.shape),
            resident(w3b.shape), resident(b3p.shape),
        ],
        out_specs=pl.BlockSpec((tb, A_pad), lambda i: (i, 0)),
        compiler_params=pltpu.CompilerParams(
            dimension_semantics=("parallel",),             # megacore-shardable batch axis
            vmem_limit_bytes=32 * 1024 * 1024,
        ),
        cost_estimate=pl.CostEstimate(
            flops=flops, transcendentals=0, bytes_accessed=bytes_accessed),
    )(x, w1b, b1, w2b, b2, w3b, b3p)

    mean = mean_pad[:B, :A]
    # std = clamp(exp(log_std), 1e-3, 1.0) — batch-independent, A elements: keep in plain JAX.
    std = jnp.clip(jnp.exp(log_std.reshape(-1)), 0.001, 1.0)
    return mean, std


def init_actor_params(key, state_size, action_size, hidden1, hidden2):
    """Deterministic synthetic init (shapes match the nn.Linear layers of Actor)."""
    ks = jax.random.split(key, 6)

    def dense(kw, kb, fan_in, fan_out):
        scale = 1.0 / jnp.sqrt(jnp.float32(fan_in))
        w = jax.random.uniform(kw, (fan_in, fan_out), jnp.float32, -scale, scale)
        b = jax.random.uniform(kb, (1, fan_out), jnp.float32, -scale, scale)
        return w, b

    w1, b1 = dense(ks[0], ks[1], state_size, hidden1)
    w2, b2 = dense(ks[2], ks[3], hidden1, hidden2)
    w3, b3 = dense(ks[4], ks[5], hidden2, action_size)
    log_std = jnp.zeros((action_size,), jnp.float32)      # nn.Parameter(torch.zeros(A))
    return (w1, b1, w2, b2, w3, b3, log_std)


if __name__ == "__main__":
    # Small shapes consistent with Actor(state_size, action_size, hidden1=400, hidden2=300)
    B, STATE, ACTION, H1, H2 = 64, 16, 8, 400, 300

    key = jax.random.PRNGKey(0)
    k_params, k_x = jax.random.split(key)
    params = init_actor_params(k_params, STATE, ACTION, H1, H2)
    x = jax.random.normal(k_x, (B, STATE), jnp.float32)

    mean, std = actor_forward(x, params)
    jax.block_until_ready((mean, std))

    # --- references ---
    w1, b1, w2, b2, w3, b3, log_std = params
    bf = jnp.bfloat16

    # bf16-consistent reference (same matmul precision as the kernel)
    h1 = jnp.maximum(jnp.dot(x.astype(bf), w1.astype(bf),
                             preferred_element_type=jnp.float32) + b1, 0.0)
    h2 = jnp.maximum(jnp.dot(h1.astype(bf), w2.astype(bf),
                             preferred_element_type=jnp.float32) + b2, 0.0)
    mean_ref_bf16 = jnp.dot(h2.astype(bf), w3.astype(bf),
                            preferred_element_type=jnp.float32) + b3

    # full-f32 reference (semantic sanity check)
    h1f = jnp.maximum(x @ w1 + b1, 0.0)
    h2f = jnp.maximum(h1f @ w2 + b2, 0.0)
    mean_ref_f32 = h2f @ w3 + b3

    std_ref = jnp.clip(jnp.exp(log_std), 0.001, 1.0)

    assert mean.shape == (B, ACTION) and std.shape == (ACTION,)
    assert jnp.allclose(mean, mean_ref_bf16, atol=2e-3, rtol=2e-3)
    assert jnp.allclose(mean, mean_ref_f32, atol=5e-2, rtol=5e-2)
    assert jnp.allclose(std, std_ref, atol=1e-6)
    print("KERNEL_OK")
</pallas_src>

<mosaic_0001>
module attributes {stable_mosaic.version = 11 : i64} {
  func.func @actor_mlp_kernel(%arg0: i32, %arg1: memref<64x16xf32, #tpu.memory_space<vmem>>, %arg2: memref<16x400xbf16, #tpu.memory_space<vmem>>, %arg3: memref<1x400xf32, #tpu.memory_space<vmem>>, %arg4: memref<400x300xbf16, #tpu.memory_space<vmem>>, %arg5: memref<1x300xf32, #tpu.memory_space<vmem>>, %arg6: memref<300x128xbf16, #tpu.memory_space<vmem>>, %arg7: memref<1x128xf32, #tpu.memory_space<vmem>>, %arg8: memref<64x128xf32, #tpu.memory_space<vmem>>) attributes {dimension_semantics = [#tpu.dimension_semantics<parallel>], iteration_bounds = array<i64: 1>, scalar_prefetch = 0 : i64, scratch_operands = 0 : i64, tpu.core_type = #tpu.core_type<tc>, window_params = [{transform_indices = @transform_0, window_bounds = array<i64: 64, 16>}, {pipeline_mode = #tpu.pipeline_mode<synchronous>, transform_indices = @transform_1, window_bounds = array<i64: 16, 400>}, {pipeline_mode = #tpu.pipeline_mode<synchronous>, transform_indices = @transform_2, window_bounds = array<i64: 1, 400>}, {pipeline_mode = #tpu.pipeline_mode<synchronous>, transform_indices = @transform_3, window_bounds = array<i64: 400, 300>}, {pipeline_mode = #tpu.pipeline_mode<synchronous>, transform_indices = @transform_4, window_bounds = array<i64: 1, 300>}, {pipeline_mode = #tpu.pipeline_mode<synchronous>, transform_indices = @transform_5, window_bounds = array<i64: 300, 128>}, {pipeline_mode = #tpu.pipeline_mode<synchronous>, transform_indices = @transform_6, window_bounds = array<i64: 1, 128>}, {transform_indices = @transform_7, window_bounds = array<i64: 64, 128>}]} {
    %c0 = arith.constant 0 : index
    %c0_0 = arith.constant 0 : index
    %0 = vector.load %arg1[%c0, %c0_0] : memref<64x16xf32, #tpu.memory_space<vmem>>, vector<64x16xf32>
    %1 = arith.truncf %0 : vector<64x16xf32> to vector<64x16xbf16>
    %c0_1 = arith.constant 0 : index
    %c0_2 = arith.constant 0 : index
    %2 = vector.load %arg2[%c0_1, %c0_2] : memref<16x400xbf16, #tpu.memory_space<vmem>>, vector<16x400xbf16>
    %cst = arith.constant dense<0.000000e+00> : vector<64x400xf32>
    %3 = tpu.matmul %1, %2, %cst {dimension_numbers = #tpu.dot_dimension_numbers<[1], [0], [0], [1], [0, 0, 1, 1], [], []>} : vector<64x16xbf16>, vector<16x400xbf16>, vector<64x400xf32> -> vector<64x400xf32>
    %c0_3 = arith.constant 0 : index
    %c0_4 = arith.constant 0 : index
    %4 = vector.load %arg3[%c0_3, %c0_4] : memref<1x400xf32, #tpu.memory_space<vmem>>, vector<1x400xf32>
    %5 = vector.broadcast %4 : vector<1x400xf32> to vector<64x400xf32>
    %6 = arith.addf %3, %5 : vector<64x400xf32>
    %cst_5 = arith.constant 0.000000e+00 : f32
    %7 = vector.broadcast %cst_5 : f32 to vector<64x400xf32>
    %8 = arith.maximumf %6, %7 : vector<64x400xf32>
    %9 = arith.truncf %8 : vector<64x400xf32> to vector<64x400xbf16>
    %c0_6 = arith.constant 0 : index
    %c0_7 = arith.constant 0 : index
    %10 = vector.load %arg4[%c0_6, %c0_7] : memref<400x300xbf16, #tpu.memory_space<vmem>>, vector<400x300xbf16>
    %cst_8 = arith.constant dense<0.000000e+00> : vector<64x300xf32>
    %11 = tpu.matmul %9, %10, %cst_8 {dimension_numbers = #tpu.dot_dimension_numbers<[1], [0], [0], [1], [0, 0, 1, 1], [], []>} : vector<64x400xbf16>, vector<400x300xbf16>, vector<64x300xf32> -> vector<64x300xf32>
    %c0_9 = arith.constant 0 : index
    %c0_10 = arith.constant 0 : index
    %12 = vector.load %arg5[%c0_9, %c0_10] : memref<1x300xf32, #tpu.memory_space<vmem>>, vector<1x300xf32>
    %13 = vector.broadcast %12 : vector<1x300xf32> to vector<64x300xf32>
    %14 = arith.addf %11, %13 : vector<64x300xf32>
    %cst_11 = arith.constant 0.000000e+00 : f32
    %15 = vector.broadcast %cst_11 : f32 to vector<64x300xf32>
    %16 = arith.maximumf %14, %15 : vector<64x300xf32>
    %17 = arith.truncf %16 : vector<64x300xf32> to vector<64x300xbf16>
    %c0_12 = arith.constant 0 : index
    %c0_13 = arith.constant 0 : index
    %18 = vector.load %arg6[%c0_12, %c0_13] : memref<300x128xbf16, #tpu.memory_space<vmem>>, vector<300x128xbf16>
    %cst_14 = arith.constant dense<0.000000e+00> : vector<64x128xf32>
    %19 = tpu.matmul %17, %18, %cst_14 {dimension_numbers = #tpu.dot_dimension_numbers<[1], [0], [0], [1], [0, 0, 1, 1], [], []>} : vector<64x300xbf16>, vector<300x128xbf16>, vector<64x128xf32> -> vector<64x128xf32>
    %c0_15 = arith.constant 0 : index
    %c0_16 = arith.constant 0 : index
    %20 = vector.load %arg7[%c0_15, %c0_16] : memref<1x128xf32, #tpu.memory_space<vmem>>, vector<1x128xf32>
    %21 = vector.broadcast %20 : vector<1x128xf32> to vector<64x128xf32>
    %22 = arith.addf %19, %21 : vector<64x128xf32>
    %c0_17 = arith.constant 0 : index
    %c0_18 = arith.constant 0 : index
    %23 = vector.load %arg8[%c0_17, %c0_18] : memref<64x128xf32, #tpu.memory_space<vmem>>, vector<64x128xf32>
    tpu.vector_store %arg8[%c0_17, %c0_18], %22 {strides = array<i32>} : memref<64x128xf32, #tpu.memory_space<vmem>>, vector<64x128xf32>,
    return
  }
  func.func @transform_0(%arg0: i32) -> (i32, i32) {
    %c0_i32 = arith.constant 0 : i32
    %c0_i32_0 = arith.constant 0 : i32
    return %arg0, %c0_i32 : i32, i32
  }
  func.func @transform_1(%arg0: i32) -> (i32, i32) {
    %c0_i32 = arith.constant 0 : i32
    %c0_i32_0 = arith.constant 0 : i32
    %c0_i32_1 = arith.constant 0 : i32
    return %c0_i32, %c0_i32_0 : i32, i32
  }
  func.func @transform_2(%arg0: i32) -> (i32, i32) {
    %c0_i32 = arith.constant 0 : i32
    %c0_i32_0 = arith.constant 0 : i32
    %c0_i32_1 = arith.constant 0 : i32
    return %c0_i32, %c0_i32_0 : i32, i32
  }
  func.func @transform_3(%arg0: i32) -> (i32, i32) {
    %c0_i32 = arith.constant 0 : i32
    %c0_i32_0 = arith.constant 0 : i32
    %c0_i32_1 = arith.constant 0 : i32
    return %c0_i32, %c0_i32_0 : i32, i32
  }
  func.func @transform_4(%arg0: i32) -> (i32, i32) {
    %c0_i32 = arith.constant 0 : i32
    %c0_i32_0 = arith.constant 0 : i32
    %c0_i32_1 = arith.constant 0 : i32
    return %c0_i32, %c0_i32_0 : i32, i32
  }
  func.func @transform_5(%arg0: i32) -> (i32, i32) {
    %c0_i32 = arith.constant 0 : i32
    %c0_i32_0 = arith.constant 0 : i32
    %c0_i32_1 = arith.constant 0 : i32
    return %c0_i32, %c0_i32_0 : i32, i32
  }
  func.func @transform_6(%arg0: i32) -> (i32, i32) {
    %c0_i32 = arith.constant 0 : i32
    %c0_i32_0 = arith.constant 0 : i32
    %c0_i32_1 = arith.constant 0 : i32
    return %c0_i32, %c0_i32_0 : i32, i32
  }
  func.func @transform_7(%arg0: i32) -> (i32, i32) {
    %c0_i32 = arith.constant 0 : i32
    %c0_i32_0 = arith.constant 0 : i32
    return %arg0, %c0_i32 : i32, i32
  }
}

</mosaic_0001>

<bundles_post_ra>
// kernel: actor_forward.1
= control target key start
LH: loop header
LB: loop body
LE: loop exit
PB: predicated region body
PF: predicated region fallthrough
CT: control target
= control target key end

     0   :  { %v1836_v1 = vmov 0   ;;  %vm85_vm0 = vcmask 130048   ;;  %vm1304_vm1 = vcmask 1045504   ;;  %vm1291_vm2 = vcmask 359424   ;;  %s2409_s1 = inlined_call_operand.vmem [shape: bf16[16,400], index: 1, kind: input, shape index: {}]   ;;  %s2410_s0 = inlined_call_operand.vmem [shape: f32[64,16], index: 0, kind: input, shape index: {}]   ;;  %s2411_s3 = inlined_call_operand.vmem [shape: bf16[400,300], index: 3, kind: input, shape index: {}]   ;;  %s2412_s2 = inlined_call_operand.vmem [shape: f32[1,400], index: 2, kind: input, shape index: {}]   ;;  %s2413_s5 = inlined_call_operand.vmem [shape: bf16[300,128], index: 5, kind: input, shape index: {}]   ;;  %s2414_s4 = inlined_call_operand.vmem [shape: f32[1,300], index: 4, kind: input, shape index: {}]   ;;  %s2415_s6 = inlined_call_operand.vmem [shape: f32[1,128], index: 6, kind: input, shape index: {}]   ;;  %s2416_s7 = inlined_call_operand.vmem [shape: f32[64,128], index: 7, kind: output, shape index: {}]  }
   0x1   :  { %v1711_v0 = vld [vmem:[%s2409_s1 + $0x4] ss:$16 sps:$4 sm:$0xff]   ;;  %130 = vmatprep.mubr.bf16.mxu0 %v1836_v1  ;;  %203 = vmatprep.mubr.bf16.mxu1 %v1836_v1  ;;  %v1713_v2 = vld [vmem:[%s2409_s1] ss:$16 sps:$4 sm:$0xff]   ;;  %v28_v4 = vld [vmem:[%s2410_s0 + $0x8] sm:$0xff] }
   0x2   :  { %v27_v3 = vld [vmem:[%s2410_s0] sm:$0xff]  ;;  %98 = vmatprep.subr.bf16.mxu0 %v1711_v0  ;;  %v1714_v6 = vld [vmem:[%s2409_s1 + $0xc] ss:$16 sps:$4 sm:$0xff]   ;;  %v29_v7 = vld [vmem:[%s2410_s0 + $0x10] sm:$0xff] }
   0x3   :  { %v35_v5 = vpack.c.bf16 %v28_v4, %v27_v3  ;;  %99 = vmatpush1.bf16.msra.mxu0 %v1713_v2  ;;  %v1716_v8 = vld [vmem:[%s2409_s1 + $0x8] ss:$16 sps:$4 sm:$0xff]   ;;  %171 = vmatprep.subr.bf16.mxu1 %v1714_v6  ;;  %v1717_v9 = vld [vmem:[%s2411_s3] ss:$12 sps:$4 sm:$0xff]   ;;  %v1719_v10 = vld [vmem:[%s2411_s3 + $0x4] ss:$12 sps:$4 sm:$0xff]   ;;  %v45_v3 = vlaneseq }
   0x4   :  { %v30_v11 = vld [vmem:[%s2410_s0 + $0x18] sm:$0xff]  ;;  %172 = vmatpush1.bf16.msra.mxu1 %v1716_v8  ;;  %821 = vmatprep.subr.bf16.mxu0 %v1719_v10  ;;  %v1725_v15 = vld [vmem:[%s2411_s3 + $0x34] ss:$12 sps:$4 sm:$0xff]   ;;  %v32_v19 = vld [vmem:[%s2410_s0 + $0x28] sm:$0xff] }
   0x5   :  { %v1722_v12 = vld [vmem:[%s2411_s3 + $0x1c] ss:$12 sps:$4 sm:$0xff]   ;;  %v1720_v13 = vld [vmem:[%s2411_s3 + $0x18] ss:$12 sps:$4 sm:$0xff]   ;;  %v36_v14 = vpack.c.bf16 %v30_v11, %v29_v7  ;;  %v1729_v25 = vld [vmem:[%s2411_s3 + $0x60] ss:$12 sps:$4 sm:$0xff]  }
   0x6   :  { %1454 = vmatmul.mubr.msk.bf16.vlgmr.msra.gmra.mrb[0].mxu0 %vm85_vm0, %v35_v5  ;;  %v1723_v16 = vld [vmem:[%s2411_s3 + $0x30] ss:$12 sps:$4 sm:$0xff]   ;;  %v1728_v17 = vld [vmem:[%s2411_s3 + $0x4c] ss:$12 sps:$4 sm:$0xff]   ;;  %v31_v18 = vld [vmem:[%s2410_s0 + $0x20] sm:$0xff]  ;;  %v2077_v4 = vshrl.u32 %v45_v3, 7 }
   0x7   :  { %140 = vmatprep.mubr.bf16.mxu0 %v1836_v1  ;;  %822 = vmatpush1.bf16.msra.mxu0 %v1717_v9  ;;  %v1726_v20 = vld [vmem:[%s2411_s3 + $0x48] ss:$12 sps:$4 sm:$0xff]   ;;  %v1731_v21 = vld [vmem:[%s2411_s3 + $0x64] ss:$12 sps:$4 sm:$0xff]   ;;  %v37_v22 = vpack.c.bf16 %v32_v19, %v31_v18  ;;  %v1749_v28 = vld [vmem:[%s2411_s3 + $0xe0] ss:$12 sps:$4 sm:$0xff]  }
   0x8   :  { %1458 = vmatmul.mubr.msk.bf16.vlgmr.msra.gmra.mrb[0].mxu1 %vm85_vm0, %v35_v5  ;;  %823 = vmatprep.subr.bf16.mxu0 %v1722_v12  ;;  %v1744_v23 = vld [vmem:[%s2411_s3 + $0xc8] ss:$12 sps:$4 sm:$0xff]   ;;  %v1750_v29 = vld [vmem:[%s2411_s3 + $0x20] ss:$12 sps:$4 sm:$0xff]   ;;  %v34_v30 = vld [vmem:[%s2410_s0 + $0x38] sm:$0xff]  ;;  %v47_v5 = vsub.s32 0, %v2077_v4 }
   0x9   :  { %213 = vmatprep.mubr.bf16.mxu1 %v1836_v1  ;;  %v1745_v24 = vld [vmem:[%s2411_s3 + $0x8] ss:$12 sps:$4 sm:$0xff]   ;;  %1569 = vmatprep.subr.bf16.mxu1 %v1744_v23  ;;  %v1732_v31 = vld [vmem:[%s2411_s3 + $0x78] ss:$12 sps:$4 sm:$0xff]   ;;  %v1735_v36 = vld [vmem:[%s2411_s3 + $0x90] ss:$12 sps:$4 sm:$0xff]  }
   0xa   :  { %v1734_v26 = vld [vmem:[%s2411_s3 + $0x7c] ss:$12 sps:$4 sm:$0xff]   ;;  %v33_v27 = vld [vmem:[%s2410_s0 + $0x30] sm:$0xff]  ;;  %1570 = vmatpush3.bf16.msra.mxu1 %v1745_v24  ;;  %v1754_v32 = vld [vmem:[%s2411_s3 + $0xf8] ss:$12 sps:$4 sm:$0xff]   ;;  %v51_v7 = vsub.s32 1, %v2077_v4 }
   0xb   :  { %824 = vmatpush1.bf16.msra.mxu0 %v1720_v13  ;;  %1571 = vmatprep.subr.bf16.mxu1 %v1749_v28  ;;  %v1755_v33 = vld [vmem:[%s2411_s3 + $0x38] ss:$12 sps:$4 sm:$0xff]   ;;  %v38_v34 = vpack.c.bf16 %v34_v30, %v33_v27  ;;  %v1737_v35 = vld [vmem:[%s2411_s3 + $0x94] ss:$12 sps:$4 sm:$0xff]   ;;  %v1759_v37 = vld [vmem:[%s2411_s3 + $0x110] ss:$12 sps:$4 sm:$0xff]  }
   0xc   :  { %825 = vmatprep.subr.bf16.mxu0 %v1725_v15  ;;  %v1760_v38 = vld [vmem:[%s2411_s3 + $0x50] ss:$12 sps:$4 sm:$0xff]   ;;  %v1740_v39 = vld [vmem:[%s2411_s3 + $0xac] ss:$12 sps:$4 sm:$0xff]   ;;  %v1764_v40 = vld [vmem:[%s2411_s3 + $0x128] ss:$12 sps:$4 sm:$0xff]  }
   0xd   :  { %v1738_v41 = vld [vmem:[%s2411_s3 + $0xa8] ss:$12 sps:$4 sm:$0xff]   ;;  %v1743_v42 = vld [vmem:[%s2411_s3 + $0xc4] ss:$12 sps:$4 sm:$0xff]   ;;  %v1769_v44 = vld [vmem:[%s2411_s3 + $0x140] ss:$12 sps:$4 sm:$0xff]  }
   0xe   :  { %1455 = vmatmul.mubr.msk.bf16.gmra.mrb[4].mxu0 %vm85_vm0, %v36_v14  ;;  %1572 = vmatpush3.bf16.msra.mxu1 %v1750_v29  ;;  %v1765_v43 = vld [vmem:[%s2411_s3 + $0x68] ss:$12 sps:$4 sm:$0xff]   ;;  %v1741_v45 = vld [vmem:[%s2411_s3 + $0xc0] ss:$12 sps:$4 sm:$0xff]   ;;  %v1746_v48 = vld [vmem:[%s2411_s3 + $0xd8] ss:$12 sps:$4 sm:$0xff]  }
   0xf   :  { %150 = vmatprep.mubr.bf16.mxu0 %v1836_v1  ;;  %826 = vmatpush1.bf16.msra.mxu0 %v1723_v16  ;;  %v1748_v46 = vld [vmem:[%s2411_s3 + $0xdc] ss:$12 sps:$4 sm:$0xff]   ;;  %v1770_v47 = vld [vmem:[%s2411_s3 + $0x80] ss:$12 sps:$4 sm:$0xff]   ;;  %v1763_v53 = vld [vmem:[%s2411_s3 + $0x124] ss:$12 sps:$4 sm:$0xff]  }
  0x10   :  { %1459 = vmatmul.mubr.msk.bf16.gmra.mrb[4].mxu1 %vm85_vm0, %v36_v14  ;;  %827 = vmatprep.subr.bf16.mxu0 %v1728_v17  ;;  %v1753_v49 = vld [vmem:[%s2411_s3 + $0xf4] ss:$12 sps:$4 sm:$0xff]   ;;  %v1751_v50 = vld [vmem:[%s2411_s3 + $0xf0] ss:$12 sps:$4 sm:$0xff]   ;;  %v1758_v51 = vld [vmem:[%s2411_s3 + $0x10c] ss:$12 sps:$4 sm:$0xff]  }
  0x11   :  { %223 = vmatprep.mubr.bf16.mxu1 %v1836_v1  ;;  %1573 = vmatprep.subr.bf16.mxu1 %v1754_v32  ;;  %v1756_v52 = vld [vmem:[%s2411_s3 + $0x108] ss:$12 sps:$4 sm:$0xff]   ;;  %v1761_v54 = vld [vmem:[%s2411_s3 + $0x120] ss:$12 sps:$4 sm:$0xff]   ;;  %v1766_v56 = vld [vmem:[%s2411_s3 + $0x138] ss:$12 sps:$4 sm:$0xff]  }
  0x12   :  { %1574 = vmatpush3.bf16.msra.mxu1 %v1755_v33  ;;  %v1768_v55 = vld [vmem:[%s2411_s3 + $0x13c] ss:$12 sps:$4 sm:$0xff]   ;;  %v1773_v57 = vld [vmem:[%s2411_s3 + $0x154] ss:$12 sps:$4 sm:$0xff]   ;;  %v1774_v58 = vld [vmem:[%s2411_s3 + $0x158] ss:$12 sps:$4 sm:$0xff]  }
  0x13   :  { %828 = vmatpush1.bf16.msra.mxu0 %v1726_v20  ;;  %1575 = vmatprep.subr.bf16.mxu1 %v1759_v37  ;;  %v1771_v59 = vld [vmem:[%s2411_s3 + $0x150] ss:$12 sps:$4 sm:$0xff]   ;;  %v1775_v60 = vld [vmem:[%s2411_s3 + $0x98] ss:$12 sps:$4 sm:$0xff]   ;;  %v1776_v63 = vld [vmem:[%s2411_s3 + $0x168] ss:$12 sps:$4 sm:$0xff]  }
  0x14   :  { %829 = vmatprep.subr.bf16.mxu0 %v1731_v21  ;;  %v1778_v61 = vld [vmem:[%s2411_s3 + $0x16c] ss:$12 sps:$4 sm:$0xff]   ;;  %v1779_v62 = vld [vmem:[%s2411_s3 + $0x170] ss:$12 sps:$4 sm:$0xff]   ;;  %v43_v6 = vld [vmem:[%s2412_s2] sm:$0xf] }
  0x15   :  { %v1780_v0 = vld [vmem:[%s2411_s3 + $0xb0] ss:$12 sps:$4 sm:$0xff]   ;;  %v2086_v8 = vrot.slane %v43_v6, %v47_v5  ;;  %v55_v9 = vsub.s32 2, %v2077_v4  ;;  %v2091_v10 = vrot.slane %v43_v6, %v51_v7  ;;  %v59_v11 = vsub.s32 3, %v2077_v4  ;;  %v1781_v37 = vld [vmem:[%s2411_s3 + $0x180] ss:$12 sps:$4 sm:$0xff]  }
  0x16   :  { %1456 = vmatmul.mubr.msk.bf16.gmra.mrb[8].mxu0 %vm85_vm0, %v37_v22  ;;  %1576 = vmatpush3.bf16.msra.mxu1 %v1760_v38  ;;  %v1783_v2 = vld [vmem:[%s2411_s3 + $0x184] ss:$12 sps:$4 sm:$0xff]   ;;  %v1784_v38 = vld [vmem:[%s2411_s3 + $0x188] ss:$12 sps:$4 sm:$0xff]  }
  0x17   :  { %160 = vmatprep.mubr.bf16.mxu0 %v1836_v1  ;;  %830 = vmatpush1.bf16.msra.mxu0 %v1729_v25  ;;  %v2097_v15 = vrot.slane %v43_v6, %v55_v9  ;;  %v2100_v18 = vrot.slane %v43_v6, %v59_v11 }
  0x18   :  { %1460 = vmatmul.mubr.msk.bf16.gmra.mrb[8].mxu1 %vm85_vm0, %v37_v22  ;;  %831 = vmatprep.subr.bf16.mxu0 %v1734_v26 }
  0x19   :  { %233 = vmatprep.mubr.bf16.mxu1 %v1836_v1  ;;  %1577 = vmatprep.subr.bf16.mxu1 %v1764_v40 }
  0x1a   :  { %1578 = vmatpush3.bf16.msra.mxu1 %v1765_v43  ;;  %v1787_v43 = vld [vmem:[%s2411_s3 + $0x19c] ss:$12 sps:$4 sm:$0xff]  }
  0x1b   :  { %832 = vmatpush1.bf16.msra.mxu0 %v1732_v31  ;;  %1579 = vmatprep.subr.bf16.mxu1 %v1769_v44 }
  0x1c   :  { %833 = vmatprep.subr.bf16.mxu0 %v1737_v35 }
  0x1e   :  { %1457 = vmatmul.mubr.msk.bf16.gmra.mrb[12].mxu0 %vm85_vm0, %v38_v34  ;;  %1580 = vmatpush3.bf16.msra.mxu1 %v1770_v47 }
  0x1f   :  { %834 = vmatpush1.bf16.msra.mxu0 %v1735_v36  ;;  %1581 = vmatprep.subr.bf16.mxu1 %v1774_v58 }
  0x20   :  { %1461 = vmatmul.mubr.msk.bf16.gmra.mrb[12].mxu1 %vm85_vm0, %v38_v34  ;;  %835 = vmatprep.subr.bf16.mxu0 %v1740_v39 }
  0x22   :  { %1582 = vmatpush3.bf16.msra.mxu1 %v1775_v60 }
  0x23   :  { %836 = vmatpush1.bf16.msra.mxu0 %v1738_v41  ;;  %1583 = vmatprep.subr.bf16.mxu1 %v1779_v62 }
  0x24   :  { %837 = vmatprep.subr.bf16.mxu0 %v1743_v42 }
  0x26   :  { %1584 = vmatpush3.bf16.msra.mxu1 %v1780_v0 }
  0x27   :  { %838 = vmatpush1.bf16.msra.mxu0 %v1741_v45  ;;  %1032 = vmatprep.subr.bf16.mxu1 %v1836_v1 }
  0x28   :  { %839 = vmatprep.subr.bf16.mxu0 %v1748_v46 }
  0x2b   :  { %840 = vmatpush1.bf16.msra.mxu0 %v1746_v48 }
  0x2c   :  { %841 = vmatprep.subr.bf16.mxu0 %v1753_v49 }
  0x2f   :  { %842 = vmatpush1.bf16.msra.mxu0 %v1751_v50 }
  0x30   :  { %843 = vmatprep.subr.bf16.mxu0 %v1758_v51 }
  0x33   :  { %844 = vmatpush1.bf16.msra.mxu0 %v1756_v52 }
  0x34   :  { %845 = vmatprep.subr.bf16.mxu0 %v1763_v53 }
  0x37   :  { %846 = vmatpush1.bf16.msra.mxu0 %v1761_v54  ;;  %v1785_v54 = vld [vmem:[%s2411_s3 + $0x198] ss:$12 sps:$4 sm:$0xff]  }
  0x38   :  { %847 = vmatprep.subr.bf16.mxu0 %v1768_v55  ;;  %v1788_v55 = vld [vmem:[%s2411_s3 + $0x1a0] ss:$12 sps:$4 sm:$0xff]  }
  0x3b   :  { %848 = vmatpush1.bf16.msra.mxu0 %v1766_v56 }
  0x3c   :  { %849 = vmatprep.subr.bf16.mxu0 %v1773_v57 }
  0x3f   :  { %850 = vmatpush1.bf16.msra.mxu0 %v1771_v59  ;;  %v1791_v59 = vld [vmem:[%s2411_s3 + $0x1b4] ss:$12 sps:$4 sm:$0xff]  }
  0x40   :  { %851 = vmatprep.subr.bf16.mxu0 %v1778_v61 }
  0x43   :  { %852 = vmatpush1.bf16.msra.mxu0 %v1776_v63 }
  0x44   :  { %894 = vmatprep.subr.bf16.mxu0 %v1783_v2 }
  0xd9   :  { %v132_v12 = vpop.f32.mrb[0].mxu0 }
  0xda   :  { %v133_v13 = vadd.f32 %v132_v12, %v2086_v8  ;;  %v134_v14 = vpop.f32.mrb[1].mxu0 }
  0xdb   :  { %v135_v16 = vadd.f32 %v134_v14, %v2091_v10  ;;  %v136_v17 = vpop.f32.mrb[2].mxu0  ;;  %v205_v22 = vpop.f32.mrb[0].mxu1  ;;  %v1789_v14 = vld [vmem:[%s2411_s3 + $0x1b0] ss:$12 sps:$4 sm:$0xff]  }
  0xdc   :  { %v137_v19 = vadd.f32 %v136_v17, %v2086_v8  ;;  %v138_v20 = vpop.f32.mrb[3].mxu0  ;;  %v244_v23 = vmax.f32 %v133_v13, 0.0  ;;  %v206_v25 = vadd.f32 %v205_v22, %v2097_v15  ;;  %v207_v26 = vpop.f32.mrb[1].mxu1  ;;  %v1795_v22 = vld [vmem:[%s2411_s3 + $0x1cc] ss:$12 sps:$4 sm:$0xff]  }
  0xdd   :  { %v139_v21 = vadd.f32 %v138_v20, %v2091_v10  ;;  %v245_v27 = vmax.f32 %v135_v16, 0.0  ;;  %v208_v29 = vadd.f32 %v207_v26, %v2100_v18  ;;  %v209_v30 = vpop.f32.mrb[2].mxu1  ;;  %v1792_v16 = vld [vmem:[%s2411_s3 + $0x1b8] ss:$12 sps:$4 sm:$0xff]  }
  0xde   :  { %v248_v24 = vmax.f32 %v137_v19, 0.0  ;;  %v246_v32 = vmax.f32 %v206_v25, 0.0  ;;  %v210_v33 = vadd.f32 %v209_v30, %v2097_v15  ;;  %v211_v34 = vpop.f32.mrb[3].mxu1 }
  0xdf   :  { %v249_v28 = vmax.f32 %v139_v21, 0.0  ;;  %v247_v39 = vmax.f32 %v208_v29, 0.0  ;;  %v212_v40 = vadd.f32 %v211_v34, %v2100_v18  ;;  %v1796_v34 = vld [vmem:[%s2411_s3 + $0x1d0] ss:$12 sps:$4 sm:$0xff]  }
  0xe0   :  { %v276_v31 = vpack.c.bf16 %v248_v24, %v244_v23  ;;  %v250_v44 = vmax.f32 %v210_v33, 0.0  ;;  %v1793_v33 = vld [vmem:[%s2411_s3 + $0x1c8] ss:$12 sps:$4 sm:$0xff]  }
  0xe1   :  { %v277_v35 = vpack.c.bf16 %v249_v28, %v245_v27  ;;  %v142_v36 = vpop.f32.mrb[4].mxu0  ;;  %v251_v47 = vmax.f32 %v212_v40, 0.0 }
  0xe2   :  { %v143_v41 = vadd.f32 %v142_v36, %v2086_v8  ;;  %v144_v42 = vpop.f32.mrb[5].mxu0  ;;  %v2120_v51 = vpack.c.bf16 %v250_v44, %v246_v32 }
  0xe3   :  { %v145_v45 = vadd.f32 %v144_v42, %v2091_v10  ;;  %v146_v46 = vpop.f32.mrb[6].mxu0  ;;  %853 = vmatprep.mubr.bf16.mxu0 %v277_v35  ;;  %999 = vmatprep.mubr.bf16.mxu1 %v277_v35  ;;  %v2129_v56 = vpack.c.bf16 %v251_v47, %v247_v39  ;;  %v215_v57 = vpop.f32.mrb[4].mxu1 }
  0xe4   :  { %v252_v48 = vmax.f32 %v143_v41, 0.0  ;;  %v147_v49 = vadd.f32 %v146_v46, %v2086_v8  ;;  %v148_v50 = vpop.f32.mrb[7].mxu0  ;;  %854 = vmatmul.mubr.bf16.vlgmr.msra.gmra.mrb[16].mxu0 %v276_v31  ;;  %1000 = vmatmul.mubr.bf16.vlgmr.msra.gmra.mrb[16].mxu1 %v276_v31  ;;  %v216_v60 = vadd.f32 %v215_v57, %v2097_v15  ;;  %v217_v61 = vpop.f32.mrb[5].mxu1 }
  0xe5   :  { %v253_v52 = vmax.f32 %v145_v45, 0.0  ;;  %v149_v53 = vadd.f32 %v148_v50, %v2091_v10  ;;  %895 = vmatpush1.bf16.msra.mxu0 %v1781_v37  ;;  %1033 = vmatpush1.bf16.msra.mxu1 %v1784_v38  ;;  %v218_v63 = vadd.f32 %v217_v61, %v2100_v18  ;;  %v219_v0 = vpop.f32.mrb[6].mxu1  ;;  %v1799_v38 = vld [vmem:[%s2411_s3 + $0x1e4] ss:$12 sps:$4 sm:$0xff]   ;;  %v1797_v50 = vld [vmem:[%s2411_s3 + $0x1e0] ss:$12 sps:$4 sm:$0xff]  }
  0xe6   :  { %v256_v58 = vmax.f32 %v147_v49, 0.0  ;;  %896 = vmatprep.subr.bf16.mxu0 %v1787_v43  ;;  %1034 = vmatprep.subr.bf16.mxu1 %v1836_v1  ;;  %v254_v3 = vmax.f32 %v216_v60, 0.0  ;;  %v220_v6 = vadd.f32 %v219_v0, %v2097_v15  ;;  %v221_v11 = vpop.f32.mrb[7].mxu1 }
  0xe7   :  { %v257_v62 = vmax.f32 %v149_v53, 0.0  ;;  %v255_v17 = vmax.f32 %v218_v63, 0.0  ;;  %v222_v19 = vadd.f32 %v221_v11, %v2100_v18 }
  0xe8   :  { %v280_v2 = vpack.c.bf16 %v256_v58, %v252_v48  ;;  %v258_v23 = vmax.f32 %v220_v6, 0.0  ;;  %v1803_v58 = vld [vmem:[%s2411_s3 + $0x1fc] ss:$12 sps:$4 sm:$0xff]  }
  0xe9   :  { %v281_v12 = vpack.c.bf16 %v257_v62, %v253_v52  ;;  %897 = vmatpush1.bf16.msra.mxu0 %v1785_v54  ;;  %1035 = vmatpush1.bf16.msra.mxu1 %v1788_v55  ;;  %v152_v13 = vpop.f32.mrb[8].mxu0  ;;  %v259_v26 = vmax.f32 %v222_v19, 0.0  ;;  %v1800_v52 = vld [vmem:[%s2411_s3 + $0x1e8] ss:$12 sps:$4 sm:$0xff]  }
  0xea   :  { %v153_v20 = vadd.f32 %v152_v13, %v2086_v8  ;;  %v154_v21 = vpop.f32.mrb[9].mxu0  ;;  %898 = vmatprep.subr.bf16.mxu0 %v1791_v59  ;;  %1036 = vmatprep.subr.bf16.mxu1 %v1836_v1  ;;  %v2152_v30 = vpack.c.bf16 %v258_v23, %v254_v3  ;;  %v1804_v13 = vld [vmem:[%s2411_s3 + $0x200] ss:$12 sps:$4 sm:$0xff]  }
  0xeb   :  { %v155_v24 = vadd.f32 %v154_v21, %v2091_v10  ;;  %v156_v25 = vpop.f32.mrb[10].mxu0  ;;  %863 = vmatprep.mubr.bf16.mxu0 %v281_v12  ;;  %1007 = vmatprep.mubr.bf16.mxu1 %v281_v12  ;;  %v2161_v35 = vpack.c.bf16 %v259_v26, %v255_v17  ;;  %v225_v36 = vpop.f32.mrb[8].mxu1  ;;  %v1801_v12 = vld [vmem:[%s2411_s3 + $0x1f8] ss:$12 sps:$4 sm:$0xff]  }
  0xec   :  { %v260_v27 = vmax.f32 %v153_v20, 0.0  ;;  %v157_v28 = vadd.f32 %v156_v25, %v2086_v8  ;;  %v158_v29 = vpop.f32.mrb[11].mxu0  ;;  %864 = vmatmul.mubr.bf16.gmra.mrb[20].mxu0 %v280_v2  ;;  %1008 = vmatmul.mubr.bf16.gmra.mrb[20].mxu1 %v280_v2  ;;  %v226_v39 = vadd.f32 %v225_v36, %v2097_v15  ;;  %v227_v40 = vpop.f32.mrb[9].mxu1 }
  0xed   :  { %v261_v31 = vmax.f32 %v155_v24, 0.0  ;;  %v159_v32 = vadd.f32 %v158_v29, %v2091_v10  ;;  %899 = vmatpush1.bf16.msra.mxu0 %v1789_v14  ;;  %1037 = vmatpush1.bf16.msra.mxu1 %v1792_v16  ;;  %v228_v42 = vadd.f32 %v227_v40, %v2100_v18  ;;  %v229_v43 = vpop.f32.mrb[10].mxu1  ;;  %v1808_v29 = vld [vmem:[%s2411_s3 + $0x218] ss:$12 sps:$4 sm:$0xff]   ;;  %v1813_v40 = vld [vmem:[%s2411_s3 + $0x240] ss:$12 sps:$4 sm:$0xff]  }
  0xee   :  { %v264_v37 = vmax.f32 %v157_v28, 0.0  ;;  %900 = vmatprep.subr.bf16.mxu0 %v1795_v22  ;;  %1038 = vmatprep.subr.bf16.mxu1 %v1836_v1  ;;  %v262_v45 = vmax.f32 %v226_v39, 0.0  ;;  %v230_v46 = vadd.f32 %v229_v43, %v2097_v15  ;;  %v231_v47 = vpop.f32.mrb[11].mxu1  ;;  %v1805_v28 = vld [vmem:[%s2411_s3 + $0x210] ss:$12 sps:$4 sm:$0xff]  }
  0xef   :  { %v265_v41 = vmax.f32 %v159_v32, 0.0  ;;  %v263_v53 = vmax.f32 %v228_v42, 0.0  ;;  %v232_v54 = vadd.f32 %v231_v47, %v2100_v18  ;;  %v1815_v39 = vld [vmem:[%s2411_s3 + $0x244] ss:$12 sps:$4 sm:$0xff]   ;;  %v1823_v43 = vld [vmem:[%s2413_s5 + $0x58] sm:$0xff]   ;;  %v1827_v47 = vld [vmem:[%s2413_s5 + $0x68] sm:$0xff]  }
  0xf0   :  { %v284_v44 = vpack.c.bf16 %v264_v37, %v260_v27  ;;  %v266_v59 = vmax.f32 %v230_v46, 0.0  ;;  %v1812_v37 = vld [vmem:[%s2411_s3 + $0x230] ss:$12 sps:$4 sm:$0xff]   ;;  %v1826_v46 = vld [vmem:[%s2413_s5 + $0x20] sm:$0xff]  }
  0xf1   :  { %v285_v48 = vpack.c.bf16 %v265_v41, %v261_v31  ;;  %901 = vmatpush1.bf16.msra.mxu0 %v1793_v33  ;;  %1039 = vmatpush1.bf16.msra.mxu1 %v1796_v34  ;;  %v162_v49 = vpop.f32.mrb[12].mxu0  ;;  %v267_v62 = vmax.f32 %v232_v54, 0.0  ;;  %v1816_v41 = vld [vmem:[%s2411_s3 + $0x248] ss:$12 sps:$4 sm:$0xff]   ;;  %v1833_v54 = vld [vmem:[%s2413_s5 + $0x38] sm:$0xff]  }
  0xf2   :  { %v163_v55 = vadd.f32 %v162_v49, %v2086_v8  ;;  %v164_v57 = vpop.f32.mrb[13].mxu0  ;;  %902 = vmatprep.subr.bf16.mxu0 %v1799_v38  ;;  %1040 = vmatprep.subr.bf16.mxu1 %v1836_v1  ;;  %v2184_v3 = vpack.c.bf16 %v266_v59, %v262_v45  ;;  %v1822_v42 = vld [vmem:[%s2413_s5 + $0x10] sm:$0xff]   ;;  %v1825_v45 = vld [vmem:[%s2413_s5 + $0x60] sm:$0xff]  }
  0xf3   :  { %v165_v60 = vadd.f32 %v164_v57, %v2091_v10  ;;  %v166_v61 = vpop.f32.mrb[14].mxu0  ;;  %873 = vmatprep.mubr.bf16.mxu0 %v285_v48  ;;  %1015 = vmatprep.mubr.bf16.mxu1 %v285_v48  ;;  %v287_v14 = vpack.c.bf16 %v267_v62, %v263_v53  ;;  %v1828_v48 = vld [vmem:[%s2413_s5 + $0x28] sm:$0xff]   ;;  %v1829_v49 = vld [vmem:[%s2413_s5 + $0x70] sm:$0xff]   ;;  %v1832_v53 = vld [vmem:[%s2413_s5 + $0x78] sm:$0xff]  }
  0xf4   :  { %v268_v63 = vmax.f32 %v163_v55, 0.0  ;;  %v167_v0 = vadd.f32 %v166_v61, %v2086_v8  ;;  %v168_v2 = vpop.f32.mrb[15].mxu0  ;;  %874 = vmatmul.mubr.bf16.gmra.mrb[24].mxu0 %v284_v44  ;;  %1016 = vmatmul.mubr.bf16.gmra.mrb[24].mxu1 %v284_v44  ;;  %v235_v8 = vpop.f32.mrb[12].mxu1  ;;  %v1824_v44 = vld [vmem:[%s2413_s5 + $0x18] sm:$0xff]   ;;  %v2304_v55 = vld [vmem:[%s2413_s5 + $0x88] sm:$0xff]  }
  0xf5   :  { %v269_v6 = vmax.f32 %v165_v60, 0.0  ;;  %v169_v11 = vadd.f32 %v168_v2, %v2091_v10  ;;  %903 = vmatpush1.bf16.msra.mxu0 %v1797_v50  ;;  %1041 = vmatpush1.bf16.msra.mxu1 %v1800_v52  ;;  %v1807_v10 = vld [vmem:[%s2411_s3 + $0x214] ss:$12 sps:$4 sm:$0xff]   ;;  %v236_v17 = vadd.f32 %v235_v8, %v2097_v15  ;;  %v237_v19 = vpop.f32.mrb[13].mxu1 }
  0xf6   :  { %v272_v16 = vmax.f32 %v167_v0, 0.0  ;;  %904 = vmatprep.subr.bf16.mxu0 %v1803_v58  ;;  %1042 = vmatprep.subr.bf16.mxu1 %v1836_v1  ;;  %v238_v21 = vadd.f32 %v237_v19, %v2100_v18  ;;  %v239_v22 = vpop.f32.mrb[14].mxu1  ;;  %v1830_v50 = vld [vmem:[%s2413_s5 + $0x30] sm:$0xff]   ;;  %v2291_v52 = vld [vmem:[%s2413_s5 + $0x80] sm:$0xff]  }
  0xf7   :  { %v273_v20 = vmax.f32 %v169_v11, 0.0  ;;  %v270_v24 = vmax.f32 %v236_v17, 0.0  ;;  %v240_v25 = vadd.f32 %v239_v22, %v2097_v15  ;;  %v241_v26 = vpop.f32.mrb[15].mxu1  ;;  %v1811_v15 = vld [vmem:[%s2411_s3 + $0x22c] ss:$12 sps:$4 sm:$0xff]  }
  0xf8   :  { %v288_v23 = vpack.c.bf16 %v272_v16, %v268_v63  ;;  %v271_v31 = vmax.f32 %v238_v21, 0.0  ;;  %v242_v32 = vadd.f32 %v241_v26, %v2100_v18  ;;  %v1809_v18 = vld [vmem:[%s2411_s3 + $0x228] ss:$12 sps:$4 sm:$0xff]   ;;  %v392_v26 = vld [vmem:[%s2414_s4] sm:$0x7] }
  0xf9   :  { %v289_v27 = vpack.c.bf16 %v273_v20, %v269_v6  ;;  %905 = vmatpush1.bf16.msra.mxu0 %v1801_v12  ;;  %1043 = vmatpush1.bf16.msra.mxu1 %v1804_v13  ;;  %v274_v33 = vmax.f32 %v240_v25, 0.0  ;;  %v2312_v57 = vld [vmem:[%s2413_s5 + $0x90] sm:$0x3f]  }
  0xfa   :  { %906 = vmatprep.subr.bf16.mxu0 %v1807_v10  ;;  %1044 = vmatprep.subr.bf16.mxu1 %v1836_v1  ;;  %v275_v34 = vmax.f32 %v242_v32, 0.0  ;;  %v2318_v58 = vsel %vm1304_vm1, %v2312_v57, 0 }
  0xfb   :  { %883 = vmatprep.mubr.bf16.mxu0 %v289_v27  ;;  %1023 = vmatprep.mubr.bf16.mxu1 %v289_v27  ;;  %v290_v36 = vpack.c.bf16 %v274_v33, %v270_v24  ;;  %v2334_v27 = vrot.slane %v392_v26, %v55_v9 }
  0xfc   :  { %884 = vmatmul.mubr.bf16.gmra.mrb[28].mxu0 %v288_v23  ;;  %1024 = vmatmul.mubr.bf16.gmra.mrb[28].mxu1 %v288_v23  ;;  %v291_v38 = vpack.c.bf16 %v275_v34, %v271_v31 }
  0xfd   :  { %907 = vmatpush1.bf16.msra.mxu0 %v1805_v28  ;;  %1045 = vmatpush1.bf16.msra.mxu1 %v1808_v29  ;;  %v2338_v28 = vrot.slane %v392_v26, %v47_v5  ;;  %v2342_v29 = vrot.slane %v392_v26, %v51_v7 }
  0xfe   :  { %908 = vmatprep.subr.bf16.mxu0 %v1811_v15  ;;  %1046 = vmatprep.subr.bf16.mxu1 %v1836_v1 }
  0xff   :  { %1537 = vmatprep.mubr.msk.bf16.mxu0 %vm85_vm0, %v2129_v56  ;;  %1541 = vmatprep.mubr.msk.bf16.mxu1 %vm85_vm0, %v2129_v56  ;;  %v1819_v56 = vld [vmem:[%s2413_s5 + $0x48] sm:$0xff]  }
 0x101   :  { %909 = vmatpush1.bf16.msra.mxu0 %v1809_v18  ;;  %1047 = vmatpush1.bf16.msra.mxu1 %v1812_v37 }
 0x102   :  { %910 = vmatprep.subr.bf16.mxu0 %v1815_v39  ;;  %1048 = vmatprep.subr.bf16.mxu1 %v1836_v1  ;;  %v1817_v1 = vld [vmem:[%s2413_s5 + $0x40] sm:$0xff]  }
 0x105   :  { %911 = vmatpush1.bf16.msra.mxu0 %v1813_v40  ;;  %1049 = vmatpush1.bf16.msra.mxu1 %v1816_v41 }
 0x106   :  { %1609 = vmatprep.subr.bf16.mxu1 %v1817_v1  ;;  %1656 = vmatprep.subr.bf16.mxu0 %v2291_v52 }
 0x108   :  { %927 = vmatmul.mubr.bf16.vlgmr.msra.gmra.mrb[16].mxu0 %v2120_v51  ;;  %1065 = vmatmul.mubr.bf16.vlgmr.msra.gmra.mrb[32].mxu1 %v2120_v51  ;;  %v1818_v51 = vld [vmem:[%s2413_s5] sm:$0xff]  }
 0x109   :  { %1538 = vmatprep.mubr.msk.bf16.mxu0 %vm85_vm0, %v2161_v35  ;;  %1542 = vmatprep.mubr.msk.bf16.mxu1 %vm85_vm0, %v2161_v35  ;;  %v1821_v35 = vld [vmem:[%s2413_s5 + $0x50] sm:$0xff]  }
 0x10a   :  { %1610 = vmatpush3.bf16.msra.mxu1 %v1818_v51  ;;  %1657 = vmatpush3.bf16.msra.mxu0 %v2291_v52 }
 0x10b   :  { %1611 = vmatprep.subr.bf16.mxu1 %v1819_v56  ;;  %1658 = vmatprep.subr.bf16.mxu0 %v2304_v55 }
 0x10e   :  { %1659 = vmatpush3.bf16.msra.mxu0 %v2304_v55 }
 0x10f   :  { %1708 = vmatprep.subr.msk.bf16.mxu0 %vm1304_vm1, %v2312_v57 }
 0x110   :  { %937 = vmatmul.mubr.bf16.gmra.mrb[20].mxu0 %v2152_v30  ;;  %1073 = vmatmul.mubr.bf16.gmra.mrb[36].mxu1 %v2152_v30  ;;  %v1820_v30 = vld [vmem:[%s2413_s5 + $0x8] sm:$0xff]  }
 0x111   :  { %1539 = vmatprep.mubr.msk.bf16.mxu0 %vm85_vm0, %v287_v14  ;;  %1543 = vmatprep.mubr.msk.bf16.mxu1 %vm85_vm0, %v287_v14 }
 0x112   :  { %1612 = vmatpush3.bf16.msra.mxu1 %v1820_v30  ;;  %1661 = vmatpush3.bf16.msra.mxu0 %v2318_v58 }
 0x113   :  { %1613 = vmatprep.subr.bf16.mxu1 %v1821_v35 }
 0x116   :  { %1614 = vmatpush3.bf16.msra.mxu1 %v1822_v42 }
 0x117   :  { %1615 = vmatprep.subr.bf16.mxu1 %v1823_v43 }
 0x118   :  { %947 = vmatmul.mubr.bf16.gmra.mrb[24].mxu0 %v2184_v3  ;;  %1081 = vmatmul.mubr.bf16.gmra.mrb[40].mxu1 %v2184_v3 }
 0x119   :  { %1540 = vmatprep.mubr.msk.bf16.mxu0 %vm85_vm0, %v291_v38  ;;  %1544 = vmatprep.mubr.msk.bf16.mxu1 %vm85_vm0, %v291_v38 }
 0x11a   :  { %1616 = vmatpush3.bf16.msra.mxu1 %v1824_v44 }
 0x11b   :  { %1617 = vmatprep.subr.bf16.mxu1 %v1825_v45 }
 0x11e   :  { %1618 = vmatpush3.bf16.msra.mxu1 %v1826_v46 }
 0x11f   :  { %1619 = vmatprep.subr.bf16.mxu1 %v1827_v47 }
 0x120   :  { %957 = vmatmul.mubr.bf16.gmra.mrb[28].mxu0 %v290_v36  ;;  %1089 = vmatmul.mubr.bf16.gmra.mrb[44].mxu1 %v290_v36 }
 0x122   :  { %1620 = vmatpush3.bf16.msra.mxu1 %v1828_v48 }
 0x123   :  { %1621 = vmatprep.subr.bf16.mxu1 %v1829_v49 }
 0x126   :  { %1622 = vmatpush3.bf16.msra.mxu1 %v1830_v50 }
 0x127   :  { %1623 = vmatprep.subr.bf16.mxu1 %v1832_v53 }
 0x12a   :  { %1624 = vmatpush3.bf16.msra.mxu1 %v1833_v54 }
 0x12b   :  { %1670 = vmatprep.subr.bf16.mxu1 %v2291_v52 }
 0x1b7   :  { %v1585_v59 = vpop.f32.mrb[16].mxu1 }
 0x1b8   :  { %v1586_v60 = vpop.f32.mrb[17].mxu1 }
 0x1b9   :  { %v1587_v61 = vadd.f32 %v1586_v60, %v1585_v59  ;;  %v1588_v62 = vpop.f32.mrb[18].mxu1 }
 0x1ba   :  { %v1589_v63 = vpop.f32.mrb[19].mxu1 }
 0x1bb   :  { %v1590_v0 = vadd.f32 %v1589_v63, %v1588_v62  ;;  %v1002_v31 = vadd.f32 %v1587_v61, %v2334_v27 }
 0x1bd   :  { %v1005_v9 = vadd.f32 %v1590_v0, %v2334_v27 }
 0x1bf   :  { %v1591_v2 = vpop.f32.mrb[20].mxu1 }
 0x1c0   :  { %v1592_v3 = vpop.f32.mrb[21].mxu1 }
 0x1c1   :  { %v1593_v6 = vadd.f32 %v1592_v3, %v1591_v2  ;;  %v1594_v11 = vpop.f32.mrb[22].mxu1 }
 0x1c2   :  { %v1595_v12 = vpop.f32.mrb[23].mxu1 }
 0x1c3   :  { %v1596_v13 = vadd.f32 %v1595_v12, %v1594_v11  ;;  %v1010_v45 = vadd.f32 %v1593_v6, %v2334_v27 }
 0x1c5   :  { %v1013_v59 = vadd.f32 %v1596_v13, %v2334_v27 }
 0x1c7   :  { %v1597_v14 = vpop.f32.mrb[24].mxu1 }
 0x1c8   :  { %v1598_v8 = vpop.f32.mrb[25].mxu1 }
 0x1c9   :  { %v2321_v16 = vadd.f32 %v1598_v8, %v1597_v14  ;;  %v1600_v10 = vpop.f32.mrb[26].mxu1 }
 0x1ca   :  { %v1601_v17 = vpop.f32.mrb[27].mxu1 }
 0x1cb   :  { %v2323_v19 = vadd.f32 %v1601_v17, %v1600_v10 }
 0x1cf   :  { %v1603_v20 = vpop.f32.mrb[28].mxu1 }
 0x1d0   :  { %v1604_v21 = vpop.f32.mrb[29].mxu1 }
 0x1d1   :  { %v2325_v22 = vadd.f32 %v1604_v21, %v1603_v20  ;;  %v1606_v23 = vpop.f32.mrb[30].mxu1  ;;  %v1018_v21 = vadd.f32 %v2321_v16, %v2334_v27 }
 0x1d2   :  { %v1607_v24 = vpop.f32.mrb[31].mxu1 }
 0x1d3   :  { %v2327_v25 = vadd.f32 %v1607_v24, %v1606_v23 }
 0x1db   :  { %v928_v32 = vpop.f32.mrb[16].mxu0  ;;  %v1066_v15 = vpop.f32.mrb[32].mxu1 }
 0x1dc   :  { %v1676_v33 = vadd.f32 %v928_v32, %v2338_v28  ;;  %v1067_v34 = vadd.f32 %v1066_v15, %v1002_v31  ;;  %v930_v36 = vpop.f32.mrb[17].mxu0  ;;  %v1068_v18 = vpop.f32.mrb[33].mxu1 }
 0x1dd   :  { %v1677_v37 = vadd.f32 %v930_v36, %v2342_v29  ;;  %v932_v38 = vpop.f32.mrb[18].mxu0  ;;  %v1069_v5 = vpop.f32.mrb[34].mxu1 }
 0x1de   :  { %v1678_v39 = vadd.f32 %v932_v38, %v2338_v28  ;;  %v1070_v4 = vadd.f32 %v1069_v5, %v1005_v9  ;;  %v934_v7 = vpop.f32.mrb[19].mxu0  ;;  %v1071_v40 = vpop.f32.mrb[35].mxu1  ;;  %v1097_v1 = vmax.f32 %v1676_v33, 0.0  ;;  %v1099_v51 = vmax.f32 %v1067_v34, 0.0 }
 0x1df   :  { %v1679_v41 = vadd.f32 %v934_v7, %v2342_v29  ;;  %v1098_v35 = vmax.f32 %v1677_v37, 0.0  ;;  %v1021_v33 = vadd.f32 %v2323_v19, %v2334_v27 }
 0x1e0   :  { %v1100_v56 = vmax.f32 %v1678_v39, 0.0  ;;  %v1102_v30 = vmax.f32 %v1070_v4, 0.0 }
 0x1e1   :  { %v1101_v42 = vmax.f32 %v1679_v41, 0.0 }
 0x1e2   :  { %v1121_v43 = vpack.c.bf16 %v1100_v56, %v1097_v1  ;;  %v1123_v44 = vpack.c.bf16 %v1102_v30, %v1099_v51  ;;  %v1026_v1 = vadd.f32 %v2325_v22, %v2334_v27 }
 0x1e3   :  { %v1122_v46 = vpack.c.bf16 %v1101_v42, %v1098_v35  ;;  %v938_v47 = vpop.f32.mrb[20].mxu0  ;;  %v1074_v48 = vpop.f32.mrb[36].mxu1 }
 0x1e4   :  { %v1680_v49 = vadd.f32 %v938_v47, %v2338_v28  ;;  %v1075_v50 = vadd.f32 %v1074_v48, %v1010_v45  ;;  %v940_v53 = vpop.f32.mrb[21].mxu0  ;;  %v1076_v54 = vpop.f32.mrb[37].mxu1  ;;  %1662 = vmatprep.mubr.msk.bf16.mxu0 %vm1291_vm2, %v1123_v44 }
 0x1e5   :  { %v1681_v60 = vadd.f32 %v940_v53, %v2342_v29  ;;  %v942_v61 = vpop.f32.mrb[22].mxu0  ;;  %v1077_v62 = vpop.f32.mrb[38].mxu1  ;;  %1340 = vmatprep.mubr.bf16.mxu1 %v1122_v46 }
 0x1e6   :  { %v1682_v63 = vadd.f32 %v942_v61, %v2338_v28  ;;  %v1078_v0 = vadd.f32 %v1077_v62, %v1013_v59  ;;  %v944_v2 = vpop.f32.mrb[23].mxu0  ;;  %v1079_v3 = vpop.f32.mrb[39].mxu1  ;;  %1341 = vmatmul.mubr.bf16.vlgmr.msra.gmra.mrb[48].mxu1 %v1121_v43  ;;  %v1103_v11 = vmax.f32 %v1680_v49, 0.0  ;;  %v1105_v12 = vmax.f32 %v1075_v50, 0.0 }
 0x1e7   :  { %v1683_v6 = vadd.f32 %v944_v2, %v2342_v29  ;;  %1673 = vmatpush3.bf16.msra.mxu1 %v2291_v52  ;;  %v1104_v13 = vmax.f32 %v1681_v60, 0.0 }
 0x1e8   :  { %v1106_v14 = vmax.f32 %v1682_v63, 0.0  ;;  %v1108_v8 = vmax.f32 %v1078_v0, 0.0  ;;  %1671 = vmatprep.subr.bf16.mxu1 %v2304_v55 }
 0x1e9   :  { %v1107_v10 = vmax.f32 %v1683_v6, 0.0 }
 0x1ea   :  { %v1124_v17 = vpack.c.bf16 %v1106_v14, %v1103_v11  ;;  %v1126_v20 = vpack.c.bf16 %v1108_v8, %v1105_v12  ;;  %v1545_v11 = vld [vmem:[%s2415_s6] ss:$0 sm:$0xff] }
 0x1eb   :  { %v1125_v23 = vpack.c.bf16 %v1107_v10, %v1104_v13  ;;  %v948_v24 = vpop.f32.mrb[24].mxu0  ;;  %v1082_v26 = vpop.f32.mrb[40].mxu1  ;;  %1674 = vmatpush3.bf16.msra.mxu1 %v2304_v55 }
 0x1ec   :  { %v1684_v52 = vadd.f32 %v948_v24, %v2338_v28  ;;  %v1083_v31 = vadd.f32 %v1082_v26, %v1018_v21  ;;  %v950_v32 = vpop.f32.mrb[25].mxu0  ;;  %v1084_v15 = vpop.f32.mrb[41].mxu1  ;;  %1663 = vmatmul.mubr.msk.bf16.vlgmr.msra.gmra.mrb[32].mxu0 %vm1291_vm2, %v1126_v20  ;;  %1709 = vmatprep.subr.msk.bf16.mxu1 %vm1304_vm1, %v2312_v57 }
 0x1ed   :  { %v1685_v16 = vadd.f32 %v950_v32, %v2342_v29  ;;  %v952_v34 = vpop.f32.mrb[26].mxu0  ;;  %v1085_v36 = vpop.f32.mrb[42].mxu1  ;;  %1348 = vmatprep.mubr.bf16.mxu1 %v1125_v23 }
 0x1ee   :  { %v1686_v55 = vadd.f32 %v952_v34, %v2338_v28  ;;  %v1086_v18 = vadd.f32 %v1085_v36, %v1021_v33  ;;  %v954_v9 = vpop.f32.mrb[27].mxu0  ;;  %v1087_v37 = vpop.f32.mrb[43].mxu1  ;;  %1349 = vmatmul.mubr.bf16.gmra.mrb[52].mxu1 %v1124_v17  ;;  %v1109_v5 = vmax.f32 %v1684_v52, 0.0  ;;  %v1111_v19 = vmax.f32 %v1083_v31, 0.0 }
 0x1ef   :  { %v1687_v38 = vadd.f32 %v954_v9, %v2342_v29  ;;  %1675 = vmatpush3.bf16.msra.mxu1 %v2318_v58  ;;  %v1110_v57 = vmax.f32 %v1685_v16, 0.0  ;;  %v1029_v58 = vadd.f32 %v2327_v25, %v2334_v27 }
 0x1f0   :  { %v1112_v39 = vmax.f32 %v1686_v55, 0.0  ;;  %v1114_v4 = vmax.f32 %v1086_v18, 0.0 }
 0x1f1   :  { %v1113_v7 = vmax.f32 %v1687_v38, 0.0 }
 0x1f2   :  { %v1127_v40 = vpack.c.bf16 %v1112_v39, %v1109_v5  ;;  %v1129_v41 = vpack.c.bf16 %v1114_v4, %v1111_v19 }
 0x1f3   :  { %v1128_v51 = vpack.c.bf16 %v1113_v7, %v1110_v57  ;;  %v958_v56 = vpop.f32.mrb[28].mxu0  ;;  %v1090_v30 = vpop.f32.mrb[44].mxu1 }
 0x1f4   :  { %v1688_v35 = vadd.f32 %v958_v56, %v2338_v28  ;;  %v1091_v42 = vadd.f32 %v1090_v30, %v1026_v1  ;;  %v960_v43 = vpop.f32.mrb[29].mxu0  ;;  %v1092_v44 = vpop.f32.mrb[45].mxu1 }
 0x1f5   :  { %v1689_v45 = vadd.f32 %v960_v43, %v2342_v29  ;;  %v962_v46 = vpop.f32.mrb[30].mxu0  ;;  %v1093_v47 = vpop.f32.mrb[46].mxu1  ;;  %1356 = vmatprep.mubr.bf16.mxu1 %v1128_v51 }
 0x1f6   :  { %v1690_v48 = vadd.f32 %v962_v46, %v2338_v28  ;;  %v1094_v49 = vadd.f32 %v1093_v47, %v1029_v58  ;;  %v964_v22 = vpop.f32.mrb[31].mxu0  ;;  %v1095_v50 = vpop.f32.mrb[47].mxu1  ;;  %1357 = vmatmul.mubr.bf16.gmra.mrb[56].mxu1 %v1127_v40  ;;  %v1115_v54 = vmax.f32 %v1688_v35, 0.0  ;;  %v1117_v59 = vmax.f32 %v1091_v42, 0.0 }
 0x1f7   :  { %v1691_v53 = vadd.f32 %v964_v22, %v2342_v29  ;;  %v1116_v62 = vmax.f32 %v1689_v45, 0.0 }
 0x1f8   :  { %v1118_v60 = vmax.f32 %v1690_v48, 0.0  ;;  %v1120_v61 = vmax.f32 %v1094_v49, 0.0 }
 0x1f9   :  { %v1119_v63 = vmax.f32 %v1691_v53, 0.0 }
 0x1fa   :  { %v1130_v25 = vpack.c.bf16 %v1118_v60, %v1115_v54  ;;  %v1132_v27 = vpack.c.bf16 %v1120_v61, %v1117_v59 }
 0x1fb   :  { %v1131_v0 = vpack.c.bf16 %v1119_v63, %v1116_v62 }
 0x1fd   :  { %1364 = vmatprep.mubr.bf16.mxu1 %v1131_v0 }
 0x1fe   :  { %1365 = vmatmul.mubr.bf16.gmra.mrb[60].mxu1 %v1130_v25 }
 0x1ff   :  { %1666 = vmatprep.mubr.msk.bf16.mxu1 %vm1291_vm2, %v1129_v41 }
 0x206   :  { %1667 = vmatmul.mubr.msk.bf16.vlgmr.msra.gmra.mrb[64].mxu1 %vm1291_vm2, %v1132_v27 }
 0x2b9   :  { %v1625_v28 = vpop.f32.mrb[48].mxu1 }
 0x2ba   :  { %v1626_v2 = vpop.f32.mrb[49].mxu1 }
 0x2bb   :  { %v1627_v3 = vadd.f32 %v1626_v2, %v1625_v28  ;;  %v1628_v6 = vpop.f32.mrb[50].mxu1 }
 0x2bc   :  { %v1629_v29 = vpop.f32.mrb[51].mxu1 }
 0x2bd   :  { %v1630_v12 = vadd.f32 %v1629_v29, %v1628_v6  ;;  %v1343_v8 = vadd.f32 %v1627_v3, %v1545_v11 }
 0x2bf   :  { %v1664_v14 = vpop.f32.mrb[32].mxu0  ;;  %v1346_v21 = vadd.f32 %v1630_v12, %v1545_v11 }
 0x2c0   :  { %v1407_v13 = vpop.f32.mrb[33].mxu0 }
 0x2c1   :  { %v1408_v10 = vadd.f32 %v1407_v13, %v1343_v8  ;;  %v1631_v17 = vpop.f32.mrb[52].mxu1  ;;  %v1665_v20 = vpop.f32.mrb[34].mxu0 }
 0x2c2   :  { %v1632_v23 = vpop.f32.mrb[53].mxu1  ;;  %v1410_v24 = vpop.f32.mrb[35].mxu0 }
 0x2c3   :  { %1438 = vst [vmem:[%s2416_s7] sm:$0xff] %v1408_v10  ;;  %v1633_v26 = vadd.f32 %v1632_v23, %v1631_v17  ;;  %v1411_v52 = vadd.f32 %v1410_v24, %v1346_v21  ;;  %v1634_v31 = vpop.f32.mrb[54].mxu1 }
 0x2c4   :  { %v1635_v32 = vpop.f32.mrb[55].mxu1 }
 0x2c5   :  { %v1351_v15 = vadd.f32 %v1633_v26, %v1545_v11  ;;  %1439 = vst [vmem:[%s2416_s7 + $0x8] sm:$0xff] %v1411_v52  ;;  %v1636_v33 = vadd.f32 %v1635_v32, %v1634_v31 }
 0x2c7   :  { %v1416_v16 = vadd.f32 %v1664_v14, %v1351_v15  ;;  %v1354_v34 = vadd.f32 %v1636_v33, %v1545_v11 }
 0x2c9   :  { %1440 = vst [vmem:[%s2416_s7 + $0x10] sm:$0xff] %v1416_v16  ;;  %v1419_v36 = vadd.f32 %v1665_v20, %v1354_v34  ;;  %v1637_v55 = vpop.f32.mrb[56].mxu1 }
 0x2ca   :  { %v1638_v18 = vpop.f32.mrb[57].mxu1 }
 0x2cb   :  { %1441 = vst [vmem:[%s2416_s7 + $0x18] sm:$0xff] %v1419_v36  ;;  %v1639_v9 = vadd.f32 %v1638_v18, %v1637_v55  ;;  %v1640_v37 = vpop.f32.mrb[58].mxu1 }
 0x2cc   :  { %v1641_v38 = vpop.f32.mrb[59].mxu1 }
 0x2cd   :  { %v1642_v5 = vadd.f32 %v1641_v38, %v1640_v37  ;;  %v1359_v51 = vadd.f32 %v1639_v9, %v1545_v11 }
 0x2cf   :  { %v1362_v44 = vadd.f32 %v1642_v5, %v1545_v11 }
 0x2d1   :  { %v1643_v19 = vpop.f32.mrb[60].mxu1 }
 0x2d2   :  { %v1644_v39 = vpop.f32.mrb[61].mxu1 }
 0x2d3   :  { %v1645_v4 = vadd.f32 %v1644_v39, %v1643_v19  ;;  %v1646_v57 = vpop.f32.mrb[62].mxu1 }
 0x2d4   :  { %v1647_v7 = vpop.f32.mrb[63].mxu1 }
 0x2d5   :  { %v1648_v40 = vadd.f32 %v1647_v7, %v1646_v57  ;;  %v1367_v41 = vadd.f32 %v1645_v4, %v1545_v11 }
 0x2d7   :  { %v1370_v35 = vadd.f32 %v1648_v40, %v1545_v11 }
 0x2d9   :  { %v1668_v1 = vpop.f32.mrb[64].mxu1 }
 0x2da   :  { %v1432_v56 = vadd.f32 %v1668_v1, %v1367_v41  ;;  %v1423_v30 = vpop.f32.mrb[65].mxu1 }
 0x2db   :  { %v1424_v42 = vadd.f32 %v1423_v30, %v1359_v51  ;;  %v1669_v43 = vpop.f32.mrb[66].mxu1 }
 0x2dc   :  { %1444 = vst [vmem:[%s2416_s7 + $0x30] sm:$0xff] %v1432_v56  ;;  %v1435_v58 = vadd.f32 %v1669_v43, %v1370_v35  ;;  %v1426_v45 = vpop.f32.mrb[67].mxu1 }
 0x2dd   :  { %1442 = vst [vmem:[%s2416_s7 + $0x20] sm:$0xff] %v1424_v42  ;;  %v1427_v46 = vadd.f32 %v1426_v45, %v1362_v44 }
 0x2de   :  { %1445 = vst [vmem:[%s2416_s7 + $0x38] sm:$0xff] %v1435_v58 }
 0x2df   :  { %1443 = vst [vmem:[%s2416_s7 + $0x28] sm:$0xff] %v1427_v46 }

</bundles_post_ra>
